<compile_context>
chip_gen: v7x
topology: tpu7x:2x2x1
jax: 0.10.0
libtpu: 0.0.40
codegen_flags: <defaults>
</compile_context>

<pallas_src>
import functools

import jax
import jax.numpy as jnp
from jax import lax
from jax.experimental import pallas as pl
from jax.experimental.pallas import tpu as pltpu


# ---------------------------------------------------------------------------
# Helpers.
# ---------------------------------------------------------------------------
def _round_up(x, m):
    return ((x + m - 1) // m) * m


def _pick_tile(n, target):
    """Largest multiple of 128 that divides n (n % 128 == 0) and is <= max(target,128)."""
    target = max(128, (target // 128) * 128)
    if n <= target:
        return n
    t = target
    while t >= 128:
        if n % t == 0:
            return t
        t -= 128
    return 128


def _head_group(heads, dim_head, lane_target):
    """Smallest divisor g of heads with g*dim_head >= lane_target (else all heads)."""
    for g in range(1, heads + 1):
        if heads % g == 0 and g * dim_head >= lane_target:
            return g
    return heads


def _vmem_limit_bytes(estimate):
    # Leave headroom for Mosaic internal scratch / spills / DMA windows: cap at 3/4
    # of the physical VMEM (48 MiB on v7x, 96 MiB on v5e/v6e), floor 16 MiB.
    try:
        phys = int(pltpu.get_tpu_info().vmem_capacity_bytes)
    except Exception:
        phys = 64 * 1024 * 1024
    cap = (phys * 3) // 4
    return int(min(max(2 * estimate, 16 * 1024 * 1024), cap))


# ---------------------------------------------------------------------------
# Kernel 1: fused K/V projection, head-group major layout.
# grid = (B, N//tn, G)
# ---------------------------------------------------------------------------
def _kv_proj_kernel(x_ref, wkv_ref, kv_ref, *, weights_resident):
    # x_ref   : (1, tn, dim)        token tile (re-used across the head-group axis)
    # wkv_ref : (G, dim, 2*gd)  or  (1, dim, 2*gd)   fused [W_k | W_v]
    # kv_ref  : (1, 1, tn, 2*gd)    lane-dense K/V output block for one head group
    w = wkv_ref[pl.program_id(2)] if weights_resident else wkv_ref[0]
    kv_ref[0, 0] = jnp.dot(x_ref[0], w,
                           preferred_element_type=jnp.float32).astype(kv_ref.dtype)


# ---------------------------------------------------------------------------
# Kernel 2: flash attention over head groups + fused Q and output projections.
# grid = (B, N//tq, G, N//tk)   (group & kv axes are reductions -> "arbitrary")
# ---------------------------------------------------------------------------
def _flash_attn_kernel(x_ref, wq_ref, kv_ref, wout_ref, o_ref,
                       q_s, m_s, l_s, acc_s, y_s, *,
                       group_size, dim_head, n_valid, n_padded,
                       compute_dtype, exact_recip, weights_resident):
    gi = pl.program_id(2)
    ki = pl.program_id(3)
    num_groups = pl.num_programs(2)
    num_kv = pl.num_programs(3)
    tk = kv_ref.shape[2]
    gd = group_size * dim_head
    w_idx = gi if weights_resident else 0

    # Zero the fused output-projection accumulator once per (batch, q-tile).
    # NOTE: the output block index (b, qi) is constant over the gi/ki reduction axes
    # (which are innermost), so Pallas keeps o_ref resident in VMEM and only writes it
    # back after the full sweep -> the single store at the end is safe.
    @pl.when(jnp.logical_and(gi == 0, ki == 0))
    def _():
        y_s[...] = jnp.zeros_like(y_s)

    # New head group: project Q once (amortized over the whole KV sweep, avoids a
    # Q round-trip through HBM) and reset the online-softmax state for each head.
    @pl.when(ki == 0)
    def _():
        q_s[...] = jnp.dot(x_ref[0], wq_ref[w_idx],
                           preferred_element_type=jnp.float32).astype(q_s.dtype)
        m_s[...] = jnp.full_like(m_s, -jnp.inf)
        l_s[...] = jnp.zeros_like(l_s)
        acc_s[...] = jnp.zeros_like(acc_s)

    q = q_s[...]                       # (tq, gd)   compute_dtype
    kv = kv_ref[0, 0]                  # (tk, 2*gd) [K | V] for this head group

    if n_padded != n_valid:            # static: mask padded key columns
        kv_col = ki * tk + lax.broadcasted_iota(jnp.int32, (1, tk), 1)
        kv_mask = kv_col < n_valid     # (1, tk)
    else:
        kv_mask = None

    for h in range(group_size):        # static unroll over heads within the group
        lo, hi = h * dim_head, (h + 1) * dim_head
        qh = q[:, lo:hi]
        kh = kv[:, lo:hi]
        vh = kv[:, gd + lo:gd + hi]
        # Scores: contract last dims of both operands (no explicit transpose); the
        # softmax scale is pre-folded into W_q.
        s = lax.dot_general(qh, kh, (((1,), (1,)), ((), ())),
                            preferred_element_type=jnp.float32)     # (tq, tk) f32
        if kv_mask is not None:
            s = jnp.where(kv_mask, s, -jnp.inf)

        m_prev = m_s[h]
        m_new = jnp.maximum(m_prev, jnp.max(s, axis=-1, keepdims=True))
        alpha = jnp.exp(m_prev - m_new)
        p = jnp.exp(s - m_new)                                       # (tq, tk) f32
        l_s[h] = alpha * l_s[h] + jnp.sum(p, axis=-1, keepdims=True)
        acc_s[h] = alpha * acc_s[h] + lax.dot_general(
            p.astype(compute_dtype), vh, (((1,), (0,)), ((), ())),
            preferred_element_type=jnp.float32)                      # (tq, dh) f32
        m_s[h] = m_new

    # Finalize this head group: normalize each head and accumulate its slice of the
    # output projection into the (tq, dim) lane-dense accumulator.
    @pl.when(ki == num_kv - 1)
    def _():
        wout_g = wout_ref[w_idx]                                     # (gd, dim)
        acc_proj = y_s[...]
        for h in range(group_size):
            lo, hi = h * dim_head, (h + 1) * dim_head
            if exact_recip:
                o_h = acc_s[h] / l_s[h]
            else:
                o_h = acc_s[h] * pl.reciprocal(l_s[h], approx=True)
            acc_proj = acc_proj + lax.dot_general(
                o_h.astype(compute_dtype), wout_g[lo:hi, :],
                (((1,), (0,)), ((), ())),
                preferred_element_type=jnp.float32)
        y_s[...] = acc_proj

    # Last group, last KV tile: write the lane-dense (tq, dim) output block once.
    @pl.when(jnp.logical_and(gi == num_groups - 1, ki == num_kv - 1))
    def _():
        o_ref[0] = y_s[...].astype(o_ref.dtype)


# ---------------------------------------------------------------------------
# Wrapper.
# ---------------------------------------------------------------------------
def attention_forward(x, w_qkv, w_out, *, heads, dim_head,
                      compute_dtype=jnp.bfloat16,
                      q_block=512, kv_block=1024, proj_block=512,
                      group_lanes=128,
                      resident_weight_bytes=8 * 1024 * 1024):
    """x: (B, N, dim). w_qkv: (dim, 3*heads*dim_head). w_out: (heads*dim_head, dim)."""
    B, N, dim = x.shape
    inner = heads * dim_head
    assert w_qkv.shape == (dim, 3 * inner)
    assert w_out.shape == (inner, dim)
    scale = dim_head ** (-0.5)

    g = _head_group(heads, dim_head, group_lanes)
    G = heads // g
    gd = g * dim_head

    # --- sequence padding + tile selection (handles N that is not a nice multiple) ---
    if N < 128:
        n_pad = _round_up(N, 8)
        tq = tk = tn = n_pad
    else:
        n_pad = _round_up(N, 128)
        tq = _pick_tile(n_pad, q_block)
        tk = _pick_tile(n_pad, kv_block)
        tn = _pick_tile(n_pad, proj_block)

    xc = x.astype(compute_dtype)
    if n_pad != N:
        xc = jnp.pad(xc, ((0, 0), (0, n_pad - N), (0, 0)))

    # --- weight prep: head-group layout, scale folded into W_q, MXU dtype cast ---
    wq, wk, wv = jnp.split(w_qkv, 3, axis=-1)                  # each (dim, inner)

    def to_groups(w):                                          # -> (G, dim, gd)
        return w.reshape(dim, G, gd).transpose(1, 0, 2)

    wq_g = (to_groups(wq) * scale).astype(compute_dtype)       # (G, dim, gd)
    wkv_g = jnp.concatenate([to_groups(wk), to_groups(wv)],
                            axis=-1).astype(compute_dtype)     # (G, dim, 2*gd)
    wo_g = w_out.reshape(G, gd, dim).astype(compute_dtype)     # (G, gd, dim)

    cs = jnp.dtype(compute_dtype).itemsize
    out_is = jnp.dtype(x.dtype).itemsize
    exact_recip = jnp.dtype(compute_dtype) == jnp.dtype(jnp.float32)
    weights_resident = (2 * dim * inner * cs) <= resident_weight_bytes

    # ---------------- kernel 1: fused K/V projection ----------------
    if weights_resident:
        wkv_spec = pl.BlockSpec((G, dim, 2 * gd), lambda b, n, gi: (0, 0, 0))
        k1_w_bytes = G * dim * 2 * gd * cs
    else:
        wkv_spec = pl.BlockSpec((1, dim, 2 * gd), lambda b, n, gi: (gi, 0, 0))
        k1_w_bytes = 2 * dim * 2 * gd * cs
    k1_est = (2 * tn * dim * cs + k1_w_bytes + 2 * tn * 2 * gd * cs
              + tn * 2 * gd * 4)

    kv = pl.pallas_call(
        functools.partial(_kv_proj_kernel, weights_resident=weights_resident),
        out_shape=jax.ShapeDtypeStruct((B, G, n_pad, 2 * gd), compute_dtype),
        grid_spec=pltpu.PrefetchScalarGridSpec(
            num_scalar_prefetch=0,
            grid=(B, n_pad // tn, G),
            in_specs=[
                pl.BlockSpec((1, tn, dim), lambda b, n, gi: (b, n, 0)),
                wkv_spec,
            ],
            out_specs=pl.BlockSpec((1, 1, tn, 2 * gd), lambda b, n, gi: (b, gi, n, 0)),
        ),
        compiler_params=pltpu.CompilerParams(
            dimension_semantics=("parallel", "parallel", "parallel"),
            vmem_limit_bytes=_vmem_limit_bytes(k1_est)),
    )(xc, wkv_g)

    # ---------------- kernel 2: flash attention + fused Q / output projections -------
    if weights_resident:
        wq_spec = pl.BlockSpec((G, dim, gd), lambda b, qi, gi, ki: (0, 0, 0))
        wo_spec = pl.BlockSpec((G, gd, dim), lambda b, qi, gi, ki: (0, 0, 0))
        k2_w_bytes = 2 * dim * inner * cs
    else:
        wq_spec = pl.BlockSpec((1, dim, gd), lambda b, qi, gi, ki: (gi, 0, 0))
        wo_spec = pl.BlockSpec((1, gd, dim), lambda b, qi, gi, ki: (gi, 0, 0))
        k2_w_bytes = 4 * dim * gd * cs

    k2_est = (2 * (tq * dim + tk * 2 * gd) * cs            # x + kv blocks (double buffered)
              + k2_w_bytes                                  # W_q + W_out
              + 2 * tq * dim * out_is                       # output block
              + tq * gd * cs                                # q scratch
              + (g * tq * (2 * 8 + dim_head) + tq * dim) * 4  # m, l, acc, y scratch
              + 4 * tq * tk * 4)                            # score / exp temporaries

    y = pl.pallas_call(
        functools.partial(_flash_attn_kernel,
                          group_size=g, dim_head=dim_head,
                          n_valid=N, n_padded=n_pad,
                          compute_dtype=compute_dtype,
                          exact_recip=exact_recip,
                          weights_resident=weights_resident),
        out_shape=jax.ShapeDtypeStruct((B, n_pad, dim), x.dtype),
        grid_spec=pltpu.PrefetchScalarGridSpec(
            num_scalar_prefetch=0,
            grid=(B, n_pad // tq, G, n_pad // tk),
            in_specs=[
                pl.BlockSpec((1, tq, dim), lambda b, qi, gi, ki: (b, qi, 0)),
                wq_spec,
                pl.BlockSpec((1, 1, tk, 2 * gd), lambda b, qi, gi, ki: (b, gi, ki, 0)),
                wo_spec,
            ],
            out_specs=pl.BlockSpec((1, tq, dim), lambda b, qi, gi, ki: (b, qi, 0)),
            scratch_shapes=[
                pltpu.VMEM((tq, gd), compute_dtype),           # Q of current head group
                pltpu.VMEM((g, tq, 1), jnp.float32),           # running max per head
                pltpu.VMEM((g, tq, 1), jnp.float32),           # running sum per head
                pltpu.VMEM((g, tq, dim_head), jnp.float32),    # per-head attention acc
                pltpu.VMEM((tq, dim), jnp.float32),            # fused output-proj acc
            ],
        ),
        # On v7x megacore, only the (B, q-tile) axes are split across the 2 TCs --
        # keep B*(N//tq) >= 2 (true for typical MIL bags) for load balance.
        compiler_params=pltpu.CompilerParams(
            dimension_semantics=("parallel", "parallel", "arbitrary", "arbitrary"),
            vmem_limit_bytes=_vmem_limit_bytes(k2_est)),
    )(xc, wq_g, kv, wo_g)

    if n_pad != N:
        y = y[:, :N, :]
    return y


# ---------------------------------------------------------------------------
# Pure-JAX reference (matches the PyTorch module in eval mode).
# ---------------------------------------------------------------------------
def _reference(x, w_qkv, w_out, *, heads, dim_head):
    B, N, dim = x.shape
    inner = heads * dim_head
    scale = dim_head ** (-0.5)
    qkv = jnp.einsum("bnd,de->bne", x, w_qkv)
    q, k, v = jnp.split(qkv, 3, axis=-1)

    def to_heads(t):
        return t.reshape(B, N, heads, dim_head).transpose(0, 2, 1, 3)  # b h n d

    q, k, v = map(to_heads, (q, k, v))
    dots = jnp.einsum("bhnd,bhmd->bhnm", q, k) * scale
    attn = jax.nn.softmax(dots, axis=-1)
    out = jnp.einsum("bhnm,bhmd->bhnd", attn, v)
    out = out.transpose(0, 2, 1, 3).reshape(B, N, inner)
    return jnp.einsum("bne,ed->bnd", out, w_out)


if __name__ == "__main__":
    def _check(name, y, y_ref, atol, rtol):
        y = jax.block_until_ready(y)
        assert y.shape == y_ref.shape, (name, y.shape, y_ref.shape)
        err = float(jnp.max(jnp.abs(y - y_ref)))
        assert jnp.allclose(y, y_ref, atol=atol, rtol=rtol), (name, err)

    root = jax.random.PRNGKey(0)
    kx, kqkv, kout, kx2, kx3, kq3, ko3 = jax.random.split(root, 7)

    # --- Test 1: small shapes (dim split evenly across heads), f32 + bf16 paths ---
    B, N, dim, heads = 2, 8, 32, 4
    dim_head = dim // heads          # 8
    inner = heads * dim_head         # 32
    x = jax.random.normal(kx, (B, N, dim), dtype=jnp.float32)
    w_qkv = jax.random.normal(kqkv, (dim, 3 * inner), dtype=jnp.float32) * 0.05
    w_out = jax.random.normal(kout, (inner, dim), dtype=jnp.float32) * 0.05
    y_ref = _reference(x, w_qkv, w_out, heads=heads, dim_head=dim_head)

    y_f32 = attention_forward(x, w_qkv, w_out, heads=heads, dim_head=dim_head,
                              compute_dtype=jnp.float32)
    _check("f32", y_f32, y_ref, atol=2e-3, rtol=1e-2)

    y_bf16 = attention_forward(x, w_qkv, w_out, heads=heads, dim_head=dim_head,
                               compute_dtype=jnp.bfloat16)
    _check("bf16", y_bf16, y_ref, atol=5e-3, rtol=5e-2)

    # --- Test 2: N not a multiple of 8 -> exercises padding + key-column masking ---
    Np = 13
    x2 = jax.random.normal(kx2, (B, Np, dim), dtype=jnp.float32)
    y_ref2 = _reference(x2, w_qkv, w_out, heads=heads, dim_head=dim_head)
    y2 = attention_forward(x2, w_qkv, w_out, heads=heads, dim_head=dim_head,
                           compute_dtype=jnp.float32)
    _check("padded", y2, y_ref2, atol=2e-3, rtol=1e-2)

    # --- Test 3: multi-tile grid, 2 head groups, non-resident-weight path ---
    B3, N3, dim3, heads3, dh3 = 1, 256, 128, 4, 64   # g=2, G=2, gd=128
    inner3 = heads3 * dh3
    x3 = jax.random.normal(kx3, (B3, N3, dim3), dtype=jnp.float32)
    w_qkv3 = jax.random.normal(kq3, (dim3, 3 * inner3), dtype=jnp.float32) * 0.05
    w_out3 = jax.random.normal(ko3, (inner3, dim3), dtype=jnp.float32) * 0.05
    y_ref3 = _reference(x3, w_qkv3, w_out3, heads=heads3, dim_head=dh3)
    y3 = attention_forward(x3, w_qkv3, w_out3, heads=heads3, dim_head=dh3,
                           compute_dtype=jnp.float32,
                           q_block=128, kv_block=128, proj_block=128,
                           resident_weight_bytes=0)
    _check("grid", y3, y_ref3, atol=5e-3, rtol=1e-2)

    print("KERNEL_OK")
</pallas_src>

<mosaic_0001>
module attributes {stable_mosaic.version = 11 : i64} {
  func.func @_kv_proj_kernel(%arg0: i32, %arg1: i32, %arg2: i32, %arg3: memref<1x8x32xf32, #tpu.memory_space<vmem>>, %arg4: memref<1x32x64xf32, #tpu.memory_space<vmem>>, %arg5: memref<1x1x8x64xf32, #tpu.memory_space<vmem>>) attributes {dimension_semantics = [#tpu.dimension_semantics<parallel>, #tpu.dimension_semantics<parallel>, #tpu.dimension_semantics<parallel>], iteration_bounds = array<i64: 2, 1, 1>, scalar_prefetch = 0 : i64, scratch_operands = 0 : i64, tpu.core_type = #tpu.core_type<tc>, window_params = [{transform_indices = @transform_0, window_bounds = array<i64: 1, 8, 32>}, {pipeline_mode = #tpu.pipeline_mode<synchronous>, transform_indices = @transform_1, window_bounds = array<i64: 1, 32, 64>}, {transform_indices = @transform_2, window_bounds = array<i64: 1, 1, 8, 64>}]} {
    %0 = arith.index_cast %arg2 : i32 to index
    %c0 = arith.constant 0 : index
    %c0_0 = arith.constant 0 : index
    %1 = vector.load %arg4[%0, %c0, %c0_0] : memref<1x32x64xf32, #tpu.memory_space<vmem>>, vector<1x32x64xf32>
    %2 = vector.shape_cast %1 : vector<1x32x64xf32> to vector<32x64xf32>
    %c0_1 = arith.constant 0 : index
    %c0_2 = arith.constant 0 : index
    %c0_3 = arith.constant 0 : index
    %3 = vector.load %arg3[%c0_1, %c0_2, %c0_3] : memref<1x8x32xf32, #tpu.memory_space<vmem>>, vector<1x8x32xf32>
    %4 = vector.shape_cast %3 : vector<1x8x32xf32> to vector<8x32xf32>
    %cst = arith.constant dense<0.000000e+00> : vector<8x64xf32>
    %5 = tpu.matmul %4, %2, %cst {dimension_numbers = #tpu.dot_dimension_numbers<[1], [0], [0], [1], [0, 0, 1, 1], [], []>} : vector<8x32xf32>, vector<32x64xf32>, vector<8x64xf32> -> vector<8x64xf32>
    %c0_4 = arith.constant 0 : index
    %c0_5 = arith.constant 0 : index
    %c0_6 = arith.constant 0 : index
    %c0_7 = arith.constant 0 : index
    %6 = vector.load %arg5[%c0_4, %c0_5, %c0_6, %c0_7] : memref<1x1x8x64xf32, #tpu.memory_space<vmem>>, vector<1x1x8x64xf32>
    %7 = vector.shape_cast %6 : vector<1x1x8x64xf32> to vector<8x64xf32>
    %8 = vector.shape_cast %5 : vector<8x64xf32> to vector<1x1x8x64xf32>
    tpu.vector_store %arg5[%c0_4, %c0_5, %c0_6, %c0_7], %8 {strides = array<i32>} : memref<1x1x8x64xf32, #tpu.memory_space<vmem>>, vector<1x1x8x64xf32>,
    return
  }
  func.func @transform_0(%arg0: i32, %arg1: i32, %arg2: i32) -> (i32, i32, i32) {
    %c0_i32 = arith.constant 0 : i32
    %c0_i32_0 = arith.constant 0 : i32
    return %arg0, %arg1, %c0_i32 : i32, i32, i32
  }
  func.func @transform_1(%arg0: i32, %arg1: i32, %arg2: i32) -> (i32, i32, i32) {
    %c0_i32 = arith.constant 0 : i32
    %c0_i32_0 = arith.constant 0 : i32
    %c0_i32_1 = arith.constant 0 : i32
    %c0_i32_2 = arith.constant 0 : i32
    return %c0_i32, %c0_i32_0, %c0_i32_1 : i32, i32, i32
  }
  func.func @transform_2(%arg0: i32, %arg1: i32, %arg2: i32) -> (i32, i32, i32, i32) {
    %c0_i32 = arith.constant 0 : i32
    %c0_i32_0 = arith.constant 0 : i32
    return %arg0, %arg2, %arg1, %c0_i32 : i32, i32, i32, i32
  }
}

</mosaic_0001>

<bundles_post_ra>
// kernel: tpu_custom_call.1
= control target key start
LH: loop header
LB: loop body
LE: loop exit
PB: predicated region body
PF: predicated region fallthrough
CT: control target
= control target key end

     0   :  { %7 = vsyncpa [#allocation3], 0  ;;  %s894_s0 = inlined_call_operand.hbm [shape: f32[2,8,32], index: 0, kind: input, shape index: {}]   ;;  %s895_s1 = inlined_call_operand.hbm [shape: f32[1,32,64], index: 1, kind: input, shape index: {}]   ;;  %s896_s2 = inlined_call_operand.hbm [shape: f32[2,1,8,64], index: 2, kind: output, shape index: {}]  }
   0x1   :  { %9 = vsyncpa [#allocation3 + $0x1], 0 }
   0x2   :  { %10 = vsyncpa [#allocation6], 0 }
   0x3   :  { %11 = vsyncpa [#allocation4], 0 }
   0x4   :  { %13 = vsyncpa [#allocation4 + $0x1], 0  ;;  %s680_s9 = smov 0   ;;  %s682_s10 = smov 0  }
   0x5   :  { %s684_s11 = smov 0   ;;  %s686_s12 = smov 0  }
   0x6   :  { %s688_s13 = smov 0   ;;  %s690_s14 = smov 0  }
   0x7 LB: > { %s395_s15 = sadd.s32 4294967295, %s655_s14   ;;  %s396_s16 = sadd.s32 4294967294, %s655_s14   ;;  %s655_s14 = sphi %s690_s14, %s19_s14   ;;  %s651_s13 = sphi %s688_s13, %s920_s13   ;;  %s647_s12 = sphi %s686_s12, %s919_s12   ;;  %s643_s11 = sphi %s684_s11, %s918_s11   ;;  %s639_s10 = sphi %s682_s10, %s917_s10   ;;  %s635_s9 = sphi %s680_s9, %s916_s9  }
   0x8   : > { %p60_p0 = scmp.ne.s32.totalorder %s639_s10, %s635_s9  ;;  %p714_p1 = scmp.eq.s32.totalorder %s395_s15, 0 }
   0x9   : > { %p718_p2 = scmp.eq.s32.totalorder %s395_s15, 1  ;;  %p115_p3 = scmp.eq.s32.totalorder %s396_s16, 1 }
   0xa   : > { %s901_s17 = scalar_select %p714_p1, 1, 0 }
   0xb   : > { %s902_s18 = scalar_select %p718_p2, 1, 0 }
   0xc   : > { %p724_p4 = por %p714_p1, %p60_p0  ;;  %p397_p5 = scmp.ge.s32.totalorder %s655_s14, 1 }
   0xd   : > { %p729_p6 = por %p115_p3, %p60_p0  ;;  %p122_p7 = scmp.lt.s32.totalorder %s655_s14, 3 }
   0xe   : > { %s903_s19 = scalar_select %p724_p4, 1, 0 }
   0xf   : > { %s904_s20 = scalar_select %p729_p6, 1, 0 }
  0x10   : > { %p734_p8 = pnand %p397_p5, %p122_p7  ;;  %s657_s22 = smov [#allocation5]  }
  0x11   : > { %s134_s23 = sshll.u32 %s657_s22, 4  ;;  %s38_s25 = sadd.s32 1, %s651_s13  ;;  %s135_s23 = int_to_ptr.vmem [resolvable:$true] %s134_s23 }
  0x12   : > { %s905_s21 = scalar_select %p734_p8, 1, 0 }
  0x13   : > { %p441_p9 = pneg %p734_p8  ;;  %s511_s28 = scalar_lea.hbm %s895_s1, 512 }
  0x14   : > { %p512_p12 = scmp.ne.s32.totalorder %s895_s1, %s511_s28  ;;  %p518_p5 = scmp.lt.u32.totalorder %s511_s28, %s895_s1 }
  0x15   : > { %p743_p11 = pnand %p441_p9, %p714_p1 }
  0x17   : > { %p513_p13 = pneg %p743_p11 }
  0x19   : > { %p514_p0 = pnand %p513_p13, %p512_p12 }
  0x1b   : > { %p515_p3 = pneg %p514_p0 }
  0x1d   : > { %p520_p7 = pnand %p518_p5, %p515_p3 }
  0x1f   : > { %523 = shalt.err (!%p520_p7)
}
  0x20   : > { %s524_s5 = scalar_lea.vmem %s135_s23, 512  ;;  %p532_p1 = scmp.lt.s32.totalorder %s135_s23, %s135_s23 }
  0x21   : > { %p525_p9 = scmp.ne.s32.totalorder %s135_s23, %s524_s5  ;;  %p533_p4 = scmp.lt.s32.totalorder %s524_s5, %s524_s5 }
  0x23   : > { %p527_p10 = pnand %p525_p9, %p513_p13  ;;  %p534_p8 = por %p533_p4, %p532_p1 }
  0x25   : > { %p528_p6 = pneg %p527_p10 }
  0x27   : > { %p535_p2 = pnand %p534_p8, %p528_p6 }
  0x29   : > { %538 = shalt.err (!%p535_p2)
}
  0x2a   : > { %s658_s6 = smov 128   ;;  %s659_s7 = smov 8  }
  0x2b   : > { %444 = dma.hbm_to_vmem [thread:$0]  (!%p743_p11), %s895_s1, 512, %s135_s23, [#allocation6], %s658_s6, %s658_s6, %s659_s7  }
  0x2c   : > { %p40_p1 = scmp.ge.s32.totalorder %s38_s25, 2  ;;  %s47_s16 = sadd.s32 1, %s643_s11 }
  0x2d   : > { %p54_p2 = scmp.ne.s32.totalorder %s643_s11, %s639_s10  ;;  %p55_p4 = scmp.eq.s32.totalorder %s655_s14, 0 }
  0x2e   : > { %s922_s25 = smov (%p40_p1, %s38_s25), 0  ;;  %p908_p8 = scmp.ne.s32.totalorder %s902_s18, 0 }
  0x2f   : > { %p770_p6 = por %p55_p4, %p54_p2  ;;  %s42_s24 = ssub.s32 %s651_s13, %s922_s25 }
  0x30   : > { %p776_p10 = por %p908_p8, %p54_p2  ;;  %p454_p12 = scmp.lt.s32.totalorder %s655_s14, 2 }
  0x31   : > { %p45_p11 = scmp.eq.s32.totalorder %s42_s24, 0  ;;  %s148_s23 = sand.u32 1, %s643_s11  }
  0x32   : > { %s400_s27 = sshll.u32 %s148_s23, 3  ;;  %s401_s29 = sshll.u32 %s651_s13, 7 }
  0x33   : > { %s785_s28 = scalar_select %p45_p11, %s643_s11, %s47_s16  }
  0x34   : > { %s791_s4 = scalar_lea.hbm %s894_s0, %s401_s29  ;;  %s152_s18 = scalar_lea.vmem [#allocation2], %s400_s27 }
  0x35   : > { %s160_s5 = sshll.u32 %s152_s18, 4  ;;  %p797_p13 = pnand %p454_p12, %p770_p6  ;;  %s793_s5 = int_to_ptr.vmem [resolvable:$true] %s160_s5 }
  0x36   : > { %s149_s7 = scalar_lea.sflag [#allocation3], %s148_s23  ;;  %s539_s8 = scalar_lea.hbm %s791_s4, 128 }
  0x37   : > { %p540_p0 = scmp.ne.s32.totalorder %s791_s4, %s539_s8  ;;  %p541_p3 = pneg %p797_p13 }
  0x38   : > { %s544_s24 = scalar_lea.hbm %s894_s0, 256  ;;  %p545_p9 = scmp.lt.u32.totalorder %s791_s4, %s894_s0 }
  0x39   : > { %p542_p5 = pnand %p541_p3, %p540_p0  ;;  %p546_p1 = scmp.lt.u32.totalorder %s544_s24, %s539_s8 }
  0x3a   : > { %p548_p4 = scmp.lt.u32.totalorder %s539_s8, %s791_s4 }
  0x3b   : > { %p543_p7 = pneg %p542_p5  ;;  %p547_p2 = por %p546_p1, %p545_p9 }
  0x3d   : > { %p549_p6 = por %p548_p4, %p547_p2 }
  0x3f   : > { %p550_p8 = pnand %p549_p6, %p543_p7 }
  0x41   : > { %553 = shalt.err (!%p550_p8)
}
  0x42   : > { %s554_s23 = scalar_lea.vmem %s793_s5, 128  ;;  %s660_s29 = smov [#allocation2]  }
  0x43   : > { %p555_p12 = scmp.ne.s32.totalorder %s793_s5, %s554_s23  ;;  %s559_s30 = sshll.u32 %s660_s29, 4  ;;  %s560_s30 = int_to_ptr.vmem [resolvable:$false] %s559_s30 }
  0x44   : > { %s561_s3 = scalar_lea.vmem %s560_s30, 256  ;;  %p562_p5 = scmp.lt.s32.totalorder %s793_s5, %s560_s30 }
  0x45   : > { %p557_p11 = pnand %p555_p12, %p541_p3  ;;  %p563_p9 = scmp.lt.s32.totalorder %s561_s3, %s554_s23 }
  0x47   : > { %p558_p0 = pneg %p557_p11  ;;  %p564_p1 = por %p563_p9, %p562_p5 }
  0x49   : > { %p565_p2 = pnand %p564_p1, %p558_p0 }
  0x4b   : > { %568 = shalt.err (!%p565_p2)
}
  0x4c   : > { %448 = dma.hbm_to_vmem [thread:$0]  (!%p797_p13), %s791_s4, 128, %s793_s5, %s149_s7  }
  0x4d   : > { %p911_p7 = scmp.ne.s32.totalorder %s905_s21, 0 }
  0x4e   : > { %s829_s18 = sand.u32 (!%p911_p7), 1, %s639_s10   ;;  %p912_p3 = scmp.ne.s32.totalorder (!%p911_p7), %s903_s19, 0 }
  0x4f   : > { %169 = sbr.rel (%p911_p7) target bundleno = 327 (0x147), region = 28  ;;  %s403_s8 = sshll.u32 (!%p911_p7), %s829_s18, 3 }
  0x50   : > { %s172_s15 = scalar_lea.sflag (!%p911_p7), [#allocation3], %s829_s18  ;;  %s175_s16 = scalar_lea.vmem (!%p911_p7), [#allocation2], %s403_s8 }
  0x56   : > { %622 = dma.done.wait (%p912_p3), %s172_s15, 128  }
  0x57   : > { %624 = vsyncadd (%p912_p3), %s172_s15, 4294967168  ;;  %p913_p4 = scmp.ne.s32.totalorder %s901_s17, 0 }
  0x59   : > { %626 = dma.done.wait (%p913_p4), [#allocation6], 512  }
  0x5a   : > { %628 = vsyncadd (%p913_p4), [#allocation6], 4294966784  ;;  %v661_v0 = vmov 0.0|0.0   ;;  %vm662_vm0 = vmmov 0   ;;  %v663_v1 = vmov 0.0   ;;  %v202_v2 = vld [vmem:[#allocation5] sm:$0xff] }
  0x5b   : > { %427 = vmatprep.subr.bf16.mxu0 %v661_v0  ;;  %424 = vmatprep.mubr.msk.f32.mxu0 %vm662_vm0, %v663_v1  ;;  %v203_v3 = vld [vmem:[#allocation5 + $0x8] sm:$0xff]  ;;  %v204_v4 = vld [vmem:[#allocation5 + $0x10] sm:$0xff]  ;;  %v205_v6 = vld [vmem:[#allocation5 + $0x18] sm:$0xff]  ;;  %vm207_vm1 = vcmask 261120   ;;  %s408_s17 = sshll.u32 %s647_s12, 7  ;;  %s199_s19 = scalar_lea.vmem [#allocation7], %s403_s8 }
  0x5c   : > { %v428_v5 = vpack.c.bf16 %v203_v3, %v202_v2  ;;  %v431_v7 = vpack.c.bf16 %v205_v6, %v204_v4  ;;  %v206_v8 = vld [vmem:[%s175_s16] sm:$0xff]  ;;  %s299_s21 = sshll.u32 %s199_s19, 4  ;;  %vm281_vm2 = vcmask 523264   ;;  %s845_s6 = scalar_lea.hbm %s896_s2, %s408_s17  ;;  %s847_s21 = int_to_ptr.vmem [resolvable:$true] %s299_s21 }
  0x5d   : > { %s284_s7 = scalar_lea.sflag [#allocation4], %s829_s18  ;;  %s569_s24 = scalar_lea.vmem %s847_s21, 128 }
  0x5e   : > { %429 = vmatpush3.bf16.msra.mxu0 %v428_v5  ;;  %p570_p13 = scmp.ne.s32.totalorder %s847_s21, %s569_s24  ;;  %s664_s12 = smov [#allocation7]  }
  0x5f   : > { %430 = vmatprep.subr.bf16.mxu0 %v661_v0  ;;  %s573_s22 = sshll.u32 %s664_s12, 4  ;;  %s574_s22 = int_to_ptr.vmem [resolvable:$false] %s573_s22 }
  0x60   : > { %p571_p6 = pnand %p570_p13, %p776_p10  ;;  %s575_s27 = scalar_lea.vmem %s574_s22, 256 }
  0x61   : > { %p576_p12 = scmp.lt.s32.totalorder %s847_s21, %s574_s22  ;;  %p577_p11 = scmp.lt.s32.totalorder %s575_s27, %s569_s24 }
  0x62   : > { %432 = vmatpush3.bf16.msra.mxu0 %v431_v7  ;;  %p572_p8 = pneg %p571_p6 }
  0x63   : > { %p578_p0 = por %p577_p11, %p576_p12 }
  0x65   : > { %425 = vmatmul.mubr.msk.f32.vlgmr.msra.gmra.mrb[0].mxu0 %vm207_vm1, %v206_v8  ;;  %p579_p5 = pnand %p578_p0, %p572_p8 }
 0x138   : > { %v277_v9 = vpop.f32.mrb[0].mxu0 }
 0x139   : > { %282 = vst.msk [vmem:[%s199_s19] sm:$0xff] %vm281_vm2, %v277_v9  ;;  %v426_v10 = vpop.f32.mrb[1].mxu0 }
 0x13a   : > { %582 = shalt.err (!%p579_p5)
}
 0x13b   : > { %s583_s23 = scalar_lea.hbm %s845_s6, 128  ;;  %s587_s3 = scalar_lea.hbm %s896_s2, 256 }
 0x13c   : > { %p584_p9 = scmp.ne.s32.totalorder %s845_s6, %s583_s23  ;;  %p588_p7 = scmp.lt.u32.totalorder %s845_s6, %s896_s2 }
 0x13d   : > { %p589_p3 = scmp.lt.u32.totalorder %s587_s3, %s583_s23  ;;  %p591_p13 = scmp.lt.u32.totalorder %s583_s23, %s845_s6 }
 0x13e   : > { %p585_p1 = pnand %p584_p9, %p776_p10 }
 0x13f   : > { %p590_p4 = por %p589_p3, %p588_p7 }
 0x140   : > { %p586_p2 = pneg %p585_p1 }
 0x141   : > { %p592_p6 = por %p591_p13, %p590_p4 }
 0x143   : > { %p593_p8 = pnand %p592_p6, %p586_p2 }
 0x145   : > { %596 = shalt.err (!%p593_p8)
}
 0x146   : > { %439 = dma.vmem_to_hbm [thread:$0]  (%p776_p10), %s847_s21, 128, %s845_s6, %s284_s7  }
 0x147 PF: > { %s311_s15 = sand.u32 1, %s635_s9   ;;  %p914_p12 = scmp.ne.s32.totalorder %s904_s20, 0 }
 0x148   : > { %p915_p11 = scmp.ge.s32.totalorder %s655_s14, 2  ;;  %s312_s16 = scalar_lea.sflag [#allocation4], %s311_s15 }
 0x14a   : > { %p450_p0 = pnand %p915_p11, %p914_p12 }
 0x14c   : > { %630 = dma.done.wait (!%p450_p0), %s312_s16, 128  }
 0x14d   : > { %632 = vsyncadd (!%p450_p0), %s312_s16, 4294967168  ;;  %s19_s14 = sadd.s32 1, %s655_s14   ;;  %s916_s9 = smov %s639_s10 }
 0x14e   : > { %p16_p5 = scmp.ge.s32.totalorder %s19_s14, 4   ;;  %s917_s10 = smov %s643_s11 }
 0x14f   : > { %s918_s11 = smov %s785_s28  ;;  %s919_s12 = smov %s651_s13 }
 0x150   : > { %s920_s13 = smov %s922_s25  ;;  %18 = sbr.rel (!%p16_p5) target bundleno = 7 (0x7), region = 78 }
 0x157   :  { %317 = vsyncpa [#allocation3], 1 }
 0x158   :  { %319 = vsyncpa [#allocation3 + $0x1], 1 }
 0x159   :  { %320 = vsyncpa [#allocation6], 1 }
 0x15a   :  { %321 = vsyncpa [#allocation4], 1 }
 0x15b   :  { %323 = vsyncpa [#allocation4 + $0x1], 1 }

</bundles_post_ra>
